<compile_context>
chip_gen: v6e
topology: v6e:2x2x1
jax: 0.10.0
libtpu: 0.0.40
codegen_flags: <defaults>
</compile_context>

<pallas_src>
import numpy as np
import jax
import jax.numpy as jnp
from jax.experimental import pallas as pl
from jax.experimental.pallas import tpu as pltpu


# --------------------------------------------------------------------------------------
# Generic (small) matmul + bias kernel: used for the hoisted input projection (stage 1)
# and the final Linear (stage 3).  Whole operands fit in VMEM at these sizes; for long
# sequences one would tile the row axis with a grid.
# --------------------------------------------------------------------------------------
def matmul_bias_kernel(x_ref, w_ref, b_ref, o_ref):
    o_ref[...] = (
        jnp.dot(x_ref[...].astype(w_ref.dtype), w_ref[...],
                preferred_element_type=jnp.float32)
        + b_ref[...]
    )


# --------------------------------------------------------------------------------------
# Stage 2: sequential 2-layer LSTM recurrence over time chunks.
#   xg_ref : (Bp, Tc, 4H) f32   precomputed  x_t @ W_ih_l0^T + b_l0  for this chunk
#   whh0   : (H,  4H) bf16      W_hh_l0^T
#   w1     : (2H, 4H) bf16      [W_ih_l1^T ; W_hh_l1^T]  (fused layer-1 weights)
#   b1     : (1,  4H) f32       b_ih_l1 + b_hh_l1
#   hout   : (Bp, H)  f32       last hidden state of the top layer
# --------------------------------------------------------------------------------------
def lstm_recurrent_kernel(xg_ref, whh0_ref, w1_ref, b1_ref, hout_ref,
                          h0_sc, c0_sc, h1_sc, c1_sc):
    t = pl.program_id(0)
    Bp, Tc, G = xg_ref.shape
    H = G // 4

    @pl.when(t == 0)
    def _():
        h0_sc[...] = jnp.zeros_like(h0_sc)
        c0_sc[...] = jnp.zeros_like(c0_sc)
        h1_sc[...] = jnp.zeros_like(h1_sc)
        c1_sc[...] = jnp.zeros_like(c1_sc)

    # Hoisted out of the unrolled time loop (broadcast_in_dim is not CSE'd).
    b1 = jnp.broadcast_to(b1_ref[...], (Bp, G))
    xg = xg_ref[...]                                  # (Bp, Tc, 4H), f32

    h0 = h0_sc[...]
    c0 = c0_sc[...]
    h1 = h1_sc[...]
    c1 = c1_sc[...]

    def gates_split(g):
        # PyTorch gate order (i, f, g, o); with H a multiple of 128 these are lane-aligned.
        return (jax.nn.sigmoid(g[:, 0 * H:1 * H]),
                jax.nn.sigmoid(g[:, 1 * H:2 * H]),
                jnp.tanh(g[:, 2 * H:3 * H]),
                jax.nn.sigmoid(g[:, 3 * H:4 * H]))

    # Statically unrolled inner loop over the Tc timesteps of this chunk: only the
    # state-dependent recurrent matmuls remain on the sequential critical path.
    for i in range(Tc):
        # Layer 0: input contribution (incl. bias) was precomputed in stage 1.
        g0 = xg[:, i, :] + jnp.dot(h0.astype(jnp.bfloat16), whh0_ref[...],
                                   preferred_element_type=jnp.float32)
        i0, f0, gg0, o0 = gates_split(g0)
        c0 = f0 * c0 + i0 * gg0
        h0 = o0 * jnp.tanh(c0)

        # Layer 1: fused [input, hidden] matmul.
        inp1 = jnp.concatenate([h0, h1], axis=1).astype(jnp.bfloat16)   # (Bp, 2H)
        g1 = jnp.dot(inp1, w1_ref[...], preferred_element_type=jnp.float32) + b1
        i1, f1, gg1, o1 = gates_split(g1)
        c1 = f1 * c1 + i1 * gg1
        h1 = o1 * jnp.tanh(c1)

    h0_sc[...] = h0
    c0_sc[...] = c0
    h1_sc[...] = h1
    c1_sc[...] = c1
    # Constant out index_map keeps this block resident; last grid step's write wins.
    hout_ref[...] = h1


# --------------------------------------------------------------------------------------
# Wrapper
# --------------------------------------------------------------------------------------
def lstm_predictor_forward(x, params, time_chunk=8):
    """x: (B, T, D) float32 -> (B, target_dim) float32."""
    B, T, D = x.shape
    H = params["whh0"].shape[0]          # whh0: (H, 4H)
    O = params["wfc"].shape[1]           # wfc:  (H, O)
    G = 4 * H

    # Pad batch to a full sublane group so VPU/EUP vregs are well occupied.
    Bp = max(8, ((B + 7) // 8) * 8)
    if Bp != B:
        x = jnp.pad(x, ((0, Bp - B), (0, 0), (0, 0)))

    # Time chunk must keep the block shape legal (multiple of 8 on the sublane axis
    # or the full time extent).
    if T % time_chunk == 0 and time_chunk % 8 == 0:
        Tc = time_chunk
    else:
        Tc = T

    small_params = pltpu.CompilerParams(vmem_limit_bytes=32 * 1024 * 1024)

    # ---- Stage 1: hoisted layer-0 input projection for ALL timesteps (one big matmul).
    x2d = x.reshape(Bp * T, D)
    xg2d = pl.pallas_call(
        matmul_bias_kernel,
        out_shape=jax.ShapeDtypeStruct((Bp * T, G), jnp.float32),
        compiler_params=small_params,
    )(x2d, params["wih0"], params["b0"])
    xg = xg2d.reshape(Bp, T, G)

    # ---- Stage 2: sequential recurrence over time chunks.
    h_top = pl.pallas_call(
        lstm_recurrent_kernel,
        out_shape=jax.ShapeDtypeStruct((Bp, H), jnp.float32),
        grid_spec=pltpu.PrefetchScalarGridSpec(
            num_scalar_prefetch=0,
            grid=(T // Tc,),
            in_specs=[
                pl.BlockSpec((Bp, Tc, G), lambda t: (0, t, 0)),   # precomputed gates
                pl.BlockSpec((H, G), lambda t: (0, 0)),           # W_hh_l0^T (bf16)
                pl.BlockSpec((2 * H, G), lambda t: (0, 0)),       # [W_ih_l1;W_hh_l1]^T (bf16)
                pl.BlockSpec((1, G), lambda t: (0, 0)),           # b_l1
            ],
            out_specs=pl.BlockSpec((Bp, H), lambda t: (0, 0)),
            scratch_shapes=[pltpu.VMEM((Bp, H), jnp.float32)] * 4,
        ),
        compiler_params=pltpu.CompilerParams(
            dimension_semantics=("arbitrary",),
            vmem_limit_bytes=32 * 1024 * 1024),
    )(xg, params["whh0"], params["w1"], params["b1"])

    # ---- Stage 3: final Linear on the last hidden state (separate tiny kernel).
    out = pl.pallas_call(
        matmul_bias_kernel,
        out_shape=jax.ShapeDtypeStruct((Bp, O), jnp.float32),
        compiler_params=small_params,
    )(h_top, params["wfc"], params["bfc"])

    return out[:B]


# --------------------------------------------------------------------------------------
# Params (PyTorch-style init, pre-transposed / fused layouts, bf16 weights, f32 biases).
# --------------------------------------------------------------------------------------
def make_params(key, input_dim, hidden_dim, target_dim):
    H, D, O = hidden_dim, input_dim, target_dim
    k = 1.0 / np.sqrt(H)
    keys = jax.random.split(key, 12)
    u = lambda kk, shape: jax.random.uniform(kk, shape, jnp.float32, -k, k)
    # PyTorch stores W_ih_l*: (4H, in), W_hh_l*: (4H, H); gate order (i, f, g, o).
    wih0 = u(keys[0], (4 * H, D)).T                                   # (D, 4H)
    whh0 = u(keys[1], (4 * H, H)).T                                   # (H, 4H)
    b0 = (u(keys[2], (4 * H,)) + u(keys[3], (4 * H,))).reshape(1, 4 * H)
    wih1 = u(keys[4], (4 * H, H)).T                                   # (H, 4H)
    whh1 = u(keys[5], (4 * H, H)).T                                   # (H, 4H)
    b1 = (u(keys[6], (4 * H,)) + u(keys[7], (4 * H,))).reshape(1, 4 * H)
    wfc = jax.random.uniform(keys[8], (O, H), jnp.float32, -k, k).T   # (H, O)
    bfc = jax.random.uniform(keys[9], (O,), jnp.float32, -k, k).reshape(1, O)

    bf16 = jnp.bfloat16
    return dict(
        wih0=wih0.astype(bf16),
        whh0=whh0.astype(bf16),
        b0=b0,
        w1=jnp.concatenate([wih1, whh1], axis=0).astype(bf16),        # (2H, 4H)
        b1=b1,
        wfc=wfc.astype(bf16),
        bfc=bfc,
    )


# --------------------------------------------------------------------------------------
# Pure-JAX reference with identical mixed-precision math (bf16 matmuls, f32 accumulate).
# --------------------------------------------------------------------------------------
def reference_forward(x, params):
    B, T, D = x.shape
    H = params["whh0"].shape[0]
    bf16 = jnp.bfloat16

    xg = (jnp.dot(x.reshape(B * T, D).astype(bf16), params["wih0"],
                  preferred_element_type=jnp.float32).reshape(B, T, 4 * H)
          + params["b0"])

    def split(g):
        return (jax.nn.sigmoid(g[:, 0 * H:1 * H]),
                jax.nn.sigmoid(g[:, 1 * H:2 * H]),
                jnp.tanh(g[:, 2 * H:3 * H]),
                jax.nn.sigmoid(g[:, 3 * H:4 * H]))

    def step(carry, xg_t):
        h0, c0, h1, c1 = carry
        g0 = xg_t + jnp.dot(h0.astype(bf16), params["whh0"],
                            preferred_element_type=jnp.float32)
        i0, f0, gg0, o0 = split(g0)
        c0 = f0 * c0 + i0 * gg0
        h0 = o0 * jnp.tanh(c0)

        g1 = (jnp.dot(jnp.concatenate([h0, h1], axis=1).astype(bf16), params["w1"],
                      preferred_element_type=jnp.float32) + params["b1"])
        i1, f1, gg1, o1 = split(g1)
        c1 = f1 * c1 + i1 * gg1
        h1 = o1 * jnp.tanh(c1)
        return (h0, c0, h1, c1), None

    z = jnp.zeros((B, H), jnp.float32)
    (h0, c0, h1, c1), _ = jax.lax.scan(step, (z, z, z, z),
                                       jnp.transpose(xg, (1, 0, 2)))
    return (jnp.dot(h1.astype(bf16), params["wfc"],
                    preferred_element_type=jnp.float32) + params["bfc"])


if __name__ == "__main__":
    # batch, seq_len, input_dim, hidden_dim, target_dim
    # (H=128 keeps gate slices lane-aligned; T=16 with Tc=8 exercises state carry
    #  across grid steps.)
    B, T, D, H, O = 2, 16, 7, 128, 7

    key = jax.random.PRNGKey(0)
    kx, kp = jax.random.split(key)
    x = jax.random.normal(kx, (B, T, D), dtype=jnp.float32)
    params = make_params(kp, D, H, O)

    out = jax.block_until_ready(lstm_predictor_forward(x, params, time_chunk=8))
    ref = jax.block_until_ready(reference_forward(x, params))

    assert out.shape == (B, O), out.shape
    np.testing.assert_allclose(np.asarray(out), np.asarray(ref), rtol=5e-3, atol=5e-3)

    print("KERNEL_OK")
</pallas_src>

<mosaic_0001>
module attributes {stable_mosaic.version = 11 : i64} {
  func.func @matmul_bias_kernel(%arg0: memref<128x7xf32, #tpu.memory_space<vmem>>, %arg1: memref<7x512xbf16, #tpu.memory_space<vmem>>, %arg2: memref<1x512xf32, #tpu.memory_space<vmem>>, %arg3: memref<128x512xf32, #tpu.memory_space<vmem>>) attributes {dimension_semantics = [], scalar_prefetch = 0 : i64, scratch_operands = 0 : i64, tpu.core_type = #tpu.core_type<tc>} {
    %c0 = arith.constant 0 : index
    %c0_0 = arith.constant 0 : index
    %0 = vector.load %arg0[%c0, %c0_0] : memref<128x7xf32, #tpu.memory_space<vmem>>, vector<128x7xf32>
    %1 = arith.truncf %0 : vector<128x7xf32> to vector<128x7xbf16>
    %c0_1 = arith.constant 0 : index
    %c0_2 = arith.constant 0 : index
    %2 = vector.load %arg1[%c0_1, %c0_2] : memref<7x512xbf16, #tpu.memory_space<vmem>>, vector<7x512xbf16>
    %cst = arith.constant dense<0.000000e+00> : vector<128x512xf32>
    %3 = tpu.matmul %1, %2, %cst {dimension_numbers = #tpu.dot_dimension_numbers<[1], [0], [0], [1], [0, 0, 1, 1], [], []>} : vector<128x7xbf16>, vector<7x512xbf16>, vector<128x512xf32> -> vector<128x512xf32>
    %c0_3 = arith.constant 0 : index
    %c0_4 = arith.constant 0 : index
    %4 = vector.load %arg2[%c0_3, %c0_4] : memref<1x512xf32, #tpu.memory_space<vmem>>, vector<1x512xf32>
    %5 = vector.broadcast %4 : vector<1x512xf32> to vector<128x512xf32>
    %6 = arith.addf %3, %5 : vector<128x512xf32>
    %c0_5 = arith.constant 0 : index
    %c0_6 = arith.constant 0 : index
    %7 = vector.load %arg3[%c0_5, %c0_6] : memref<128x512xf32, #tpu.memory_space<vmem>>, vector<128x512xf32>
    tpu.vector_store %arg3[%c0_5, %c0_6], %6 {strides = array<i32>} : memref<128x512xf32, #tpu.memory_space<vmem>>, vector<128x512xf32>,
    return
  }
}

</mosaic_0001>

<bundles_post_ra>
// kernel: tpu_custom_call.1
= control target key start
LH: loop header
LB: loop body
LE: loop exit
PB: predicated region body
PF: predicated region fallthrough
CT: control target
= control target key end

     0   :  { %vm99_vm0 = vcmask 1042432   ;;  %vm100_vm1 = vcmask 1043456   ;;  %v472_v3 = vmov 65535   ;;  %v473_v7 = vmov 0   ;;  %s645_s0 = inlined_call_operand.vmem [shape: f32[128,7], index: 0, kind: input, shape index: {}]   ;;  %s646_s1 = inlined_call_operand.vmem [shape: bf16[7,512], index: 1, kind: input, shape index: {}]   ;;  %s647_s2 = inlined_call_operand.vmem [shape: f32[1,512], index: 2, kind: input, shape index: {}]   ;;  %s648_s3 = inlined_call_operand.hbm [shape: f32[128,512], index: 3, kind: output, shape index: {}]  }
   0x1   :  { %v40_v0 = vld [vmem:[%s646_s1] sm:$0xff]  ;;  %v41_v1 = vld [vmem:[%s646_s1 + $0x8] sm:$0xff]  ;;  %v101_v4 = vsel %vm99_vm0, 4294967295, %v472_v3  ;;  %147 = vmatprep.mubr.bf16.mxu0 %v473_v7  ;;  %260 = vmatprep.mubr.bf16.mxu1 %v473_v7  ;;  %vm74_vm2 = vcmask 56320  }
   0x2   :  { %v422_v2 = vcombine.high %v40_v0, %v40_v0  ;;  %v424_v5 = vcombine.high %v41_v1, %v41_v1  ;;  %v421_v6 = vcombine.low %v40_v0, %v40_v0  ;;  %v102_v8 = vsel %vm100_vm1, %v101_v4, 0  ;;  %v16_v10 = vld [vmem:[%s645_s0] sm:$0xff]  ;;  %v17_v11 = vld [vmem:[%s645_s0 + $0x8] sm:$0xff] }
   0x3   :  { %v423_v9 = vcombine.low %v41_v1, %v41_v1  ;;  %v32_v16 = vpack.c.bf16 %v17_v11, %v16_v10 }
   0x4   :  { %v107_v12 = vand.u32 %v422_v2, %v102_v8  ;;  %v113_v13 = vand.u32 %v424_v5, %v102_v8  ;;  %v104_v14 = vand.u32 %v421_v6, %v102_v8 }
   0x5   :  { %v110_v15 = vand.u32 %v423_v9, %v102_v8 }
   0x6   :  { %129 = vmatprep.subr.bf16.mxu0 %v107_v12  ;;  %242 = vmatprep.subr.bf16.mxu1 %v113_v13 }
   0x7   :  { %130 = vmatpush1.bf16.msra.mxu0 %v104_v14  ;;  %243 = vmatpush1.bf16.msra.mxu1 %v110_v15 }
   0x8   :  { %8 = vsyncpa [#allocation3], 0  ;;  %v18_v17 = vld [vmem:[%s645_s0 + $0x10] sm:$0xff]  ;;  %v19_v18 = vld [vmem:[%s645_s0 + $0x18] sm:$0xff]  ;;  %v44_v38 = vlaneseq }
   0x9   :  { %v33_v19 = vpack.c.bf16 %v19_v18, %v18_v17  ;;  %v20_v20 = vld [vmem:[%s645_s0 + $0x20] sm:$0xff]  ;;  %v21_v21 = vld [vmem:[%s645_s0 + $0x28] sm:$0xff]  ;;  %v22_v23 = vld [vmem:[%s645_s0 + $0x30] sm:$0xff] }
   0xa   :  { %425 = vmatmul.mubr.msk.bf16.vlgmr.msra.gmra.mxu0 %vm74_vm2, %v32_v16  ;;  %433 = vmatmul.mubr.msk.bf16.vlgmr.msra.gmra.mxu1 %vm74_vm2, %v32_v16  ;;  %v34_v22 = vpack.c.bf16 %v21_v21, %v20_v20  ;;  %v23_v24 = vld [vmem:[%s645_s0 + $0x38] sm:$0xff]  ;;  %v24_v26 = vld [vmem:[%s645_s0 + $0x40] sm:$0xff]  ;;  %v25_v27 = vld [vmem:[%s645_s0 + $0x48] sm:$0xff]  ;;  %v45_v39 = vshrl.u32 %v44_v38, 7 }
   0xb   :  { %157 = vmatprep.mubr.bf16.mxu0 %v473_v7  ;;  %270 = vmatprep.mubr.bf16.mxu1 %v473_v7  ;;  %v35_v25 = vpack.c.bf16 %v23_v24, %v22_v23  ;;  %v36_v28 = vpack.c.bf16 %v25_v27, %v24_v26  ;;  %v26_v29 = vld [vmem:[%s645_s0 + $0x50] sm:$0xff]  ;;  %v27_v30 = vld [vmem:[%s645_s0 + $0x58] sm:$0xff]  ;;  %v28_v32 = vld [vmem:[%s645_s0 + $0x60] sm:$0xff] }
   0xc   :  { %v37_v31 = vpack.c.bf16 %v27_v30, %v26_v29  ;;  %v29_v33 = vld [vmem:[%s645_s0 + $0x68] sm:$0xff]  ;;  %v30_v35 = vld [vmem:[%s645_s0 + $0x70] sm:$0xff]  ;;  %v31_v36 = vld [vmem:[%s645_s0 + $0x78] sm:$0xff]  ;;  %v46_v40 = vsub.s32 0, %v45_v39  ;;  %v54_v41 = vsub.s32 2, %v45_v39  ;;  %v50_v43 = vsub.s32 1, %v45_v39 }
   0xd   :  { %v38_v34 = vpack.c.bf16 %v29_v33, %v28_v32  ;;  %v39_v37 = vpack.c.bf16 %v31_v36, %v30_v35  ;;  %v42_v42 = vld [vmem:[%s647_s2] sm:$0xf]  ;;  %v58_v44 = vsub.s32 3, %v45_v39  ;;  %s474_s0 = smov [#allocation2]  }
   0xe   :  { %v570_v45 = vrot.slane %v42_v42, %v46_v40  ;;  %v572_v46 = vrot.slane %v42_v42, %v54_v41  ;;  %v574_v47 = vrot.slane %v42_v42, %v50_v43  ;;  %s410_s2 = sshll.u32 %s474_s0, 4  ;;  %s411_s2 = int_to_ptr.vmem [resolvable:$true] %s410_s2 }
   0xf   :  { %v576_v48 = vrot.slane %v42_v42, %v58_v44  ;;  %s450_s21 = scalar_lea.vmem %s411_s2, 8192  ;;  %p455_p1 = scmp.lt.s32.totalorder %s411_s2, %s411_s2 }
  0x10   :  { %p451_p0 = scmp.ne.s32.totalorder %s411_s2, %s450_s21  ;;  %p456_p2 = scmp.lt.s32.totalorder %s450_s21, %s450_s21 }
  0x12   :  { %426 = vmatmul.mubr.msk.bf16.gmra.mxu0 %vm74_vm2, %v33_v19  ;;  %434 = vmatmul.mubr.msk.bf16.gmra.mxu1 %vm74_vm2, %v33_v19  ;;  %p457_p3 = por %p456_p2, %p455_p1 }
  0x13   :  { %167 = vmatprep.mubr.bf16.mxu0 %v473_v7  ;;  %280 = vmatprep.mubr.bf16.mxu1 %v473_v7 }
  0x14   :  { %p458_p4 = pnand %p457_p3, %p451_p0 }
  0x1a   :  { %427 = vmatmul.mubr.msk.bf16.gmra.mxu0 %vm74_vm2, %v34_v22  ;;  %435 = vmatmul.mubr.msk.bf16.gmra.mxu1 %vm74_vm2, %v34_v22 }
  0x1b   :  { %177 = vmatprep.mubr.bf16.mxu0 %v473_v7  ;;  %290 = vmatprep.mubr.bf16.mxu1 %v473_v7 }
  0x22   :  { %428 = vmatmul.mubr.msk.bf16.gmra.mxu0 %vm74_vm2, %v35_v25  ;;  %436 = vmatmul.mubr.msk.bf16.gmra.mxu1 %vm74_vm2, %v35_v25 }
  0x23   :  { %187 = vmatprep.mubr.bf16.mxu0 %v473_v7  ;;  %300 = vmatprep.mubr.bf16.mxu1 %v473_v7 }
  0x2a   :  { %429 = vmatmul.mubr.msk.bf16.gmra.mxu0 %vm74_vm2, %v36_v28  ;;  %437 = vmatmul.mubr.msk.bf16.gmra.mxu1 %vm74_vm2, %v36_v28 }
  0x2b   :  { %197 = vmatprep.mubr.bf16.mxu0 %v473_v7  ;;  %310 = vmatprep.mubr.bf16.mxu1 %v473_v7 }
  0x32   :  { %430 = vmatmul.mubr.msk.bf16.gmra.mxu0 %vm74_vm2, %v37_v31  ;;  %438 = vmatmul.mubr.msk.bf16.gmra.mxu1 %vm74_vm2, %v37_v31 }
  0x33   :  { %207 = vmatprep.mubr.bf16.mxu0 %v473_v7  ;;  %320 = vmatprep.mubr.bf16.mxu1 %v473_v7 }
  0x3a   :  { %431 = vmatmul.mubr.msk.bf16.gmra.mxu0 %vm74_vm2, %v38_v34  ;;  %439 = vmatmul.mubr.msk.bf16.gmra.mxu1 %vm74_vm2, %v38_v34 }
  0x3b   :  { %217 = vmatprep.mubr.bf16.mxu0 %v473_v7  ;;  %330 = vmatprep.mubr.bf16.mxu1 %v473_v7 }
  0x42   :  { %432 = vmatmul.mubr.msk.bf16.gmra.mxu0 %vm74_vm2, %v39_v37  ;;  %440 = vmatmul.mubr.msk.bf16.gmra.mxu1 %vm74_vm2, %v39_v37 }
  0xca   :  { %v149_v49 = vpop.f32.mrf.mxu0  ;;  %v262_v50 = vpop.f32.mrf.mxu1 }
  0xcb   :  { %v150_v51 = vadd.f32 %v149_v49, %v570_v45  ;;  %v263_v52 = vadd.f32 %v262_v50, %v572_v46 }
  0xcc   :  { %v151_v53 = vpop.f32.mrf.mxu0  ;;  %v264_v54 = vpop.f32.mrf.mxu1 }
  0xcd   :  { %341 = vst [vmem:[#allocation2] sm:$0xff] %v150_v51  ;;  %343 = vst [vmem:[#allocation2 + $0x10] sm:$0xff] %v263_v52  ;;  %v152_v55 = vadd.f32 %v151_v53, %v574_v47  ;;  %v265_v56 = vadd.f32 %v264_v54, %v576_v48 }
  0xce   :  { %v153_v57 = vpop.f32.mrf.mxu0  ;;  %v266_v58 = vpop.f32.mrf.mxu1 }
  0xcf   :  { %342 = vst [vmem:[#allocation2 + $0x8] sm:$0xff] %v152_v55  ;;  %344 = vst [vmem:[#allocation2 + $0x18] sm:$0xff] %v265_v56  ;;  %v154_v59 = vadd.f32 %v153_v57, %v570_v45  ;;  %v267_v60 = vadd.f32 %v266_v58, %v572_v46 }
  0xd0   :  { %v155_v61 = vpop.f32.mrf.mxu0  ;;  %v268_v62 = vpop.f32.mrf.mxu1 }
  0xd1   :  { %345 = vst [vmem:[#allocation2 + $0x20] sm:$0xff] %v154_v59  ;;  %347 = vst [vmem:[#allocation2 + $0x30] sm:$0xff] %v267_v60  ;;  %v156_v63 = vadd.f32 %v155_v61, %v574_v47  ;;  %v269_v0 = vadd.f32 %v268_v62, %v576_v48 }
  0xd2   :  { %v159_v1 = vpop.f32.mrf.mxu0  ;;  %v272_v2 = vpop.f32.mrf.mxu1 }
  0xd3   :  { %346 = vst [vmem:[#allocation2 + $0x28] sm:$0xff] %v156_v63  ;;  %348 = vst [vmem:[#allocation2 + $0x38] sm:$0xff] %v269_v0  ;;  %v160_v3 = vadd.f32 %v159_v1, %v570_v45  ;;  %v273_v4 = vadd.f32 %v272_v2, %v572_v46 }
  0xd4   :  { %v161_v5 = vpop.f32.mrf.mxu0  ;;  %v274_v6 = vpop.f32.mrf.mxu1 }
  0xd5   :  { %349 = vst [vmem:[#allocation2 + $0x40] sm:$0xff] %v160_v3  ;;  %351 = vst [vmem:[#allocation2 + $0x50] sm:$0xff] %v273_v4  ;;  %v162_v7 = vadd.f32 %v161_v5, %v574_v47  ;;  %v275_v8 = vadd.f32 %v274_v6, %v576_v48 }
  0xd6   :  { %v163_v9 = vpop.f32.mrf.mxu0  ;;  %v276_v10 = vpop.f32.mrf.mxu1 }
  0xd7   :  { %350 = vst [vmem:[#allocation2 + $0x48] sm:$0xff] %v162_v7  ;;  %352 = vst [vmem:[#allocation2 + $0x58] sm:$0xff] %v275_v8  ;;  %v164_v11 = vadd.f32 %v163_v9, %v570_v45  ;;  %v277_v12 = vadd.f32 %v276_v10, %v572_v46 }
  0xd8   :  { %v165_v13 = vpop.f32.mrf.mxu0  ;;  %v278_v14 = vpop.f32.mrf.mxu1 }
  0xd9   :  { %353 = vst [vmem:[#allocation2 + $0x60] sm:$0xff] %v164_v11  ;;  %355 = vst [vmem:[#allocation2 + $0x70] sm:$0xff] %v277_v12  ;;  %v166_v15 = vadd.f32 %v165_v13, %v574_v47  ;;  %v279_v16 = vadd.f32 %v278_v14, %v576_v48 }
  0xda   :  { %v169_v17 = vpop.f32.mrf.mxu0  ;;  %v282_v18 = vpop.f32.mrf.mxu1 }
  0xdb   :  { %354 = vst [vmem:[#allocation2 + $0x68] sm:$0xff] %v166_v15  ;;  %356 = vst [vmem:[#allocation2 + $0x78] sm:$0xff] %v279_v16  ;;  %v170_v19 = vadd.f32 %v169_v17, %v570_v45  ;;  %v283_v20 = vadd.f32 %v282_v18, %v572_v46 }
  0xdc   :  { %v171_v21 = vpop.f32.mrf.mxu0  ;;  %v284_v22 = vpop.f32.mrf.mxu1 }
  0xdd   :  { %357 = vst [vmem:[#allocation2 + $0x80] sm:$0xff] %v170_v19  ;;  %359 = vst [vmem:[#allocation2 + $0x90] sm:$0xff] %v283_v20  ;;  %v172_v23 = vadd.f32 %v171_v21, %v574_v47  ;;  %v285_v24 = vadd.f32 %v284_v22, %v576_v48 }
  0xde   :  { %v173_v25 = vpop.f32.mrf.mxu0  ;;  %v286_v26 = vpop.f32.mrf.mxu1 }
  0xdf   :  { %358 = vst [vmem:[#allocation2 + $0x88] sm:$0xff] %v172_v23  ;;  %360 = vst [vmem:[#allocation2 + $0x98] sm:$0xff] %v285_v24  ;;  %v174_v27 = vadd.f32 %v173_v25, %v570_v45  ;;  %v287_v28 = vadd.f32 %v286_v26, %v572_v46 }
  0xe0   :  { %v175_v29 = vpop.f32.mrf.mxu0  ;;  %v288_v30 = vpop.f32.mrf.mxu1 }
  0xe1   :  { %361 = vst [vmem:[#allocation2 + $0xa0] sm:$0xff] %v174_v27  ;;  %363 = vst [vmem:[#allocation2 + $0xb0] sm:$0xff] %v287_v28  ;;  %v176_v31 = vadd.f32 %v175_v29, %v574_v47  ;;  %v289_v32 = vadd.f32 %v288_v30, %v576_v48 }
  0xe2   :  { %v179_v33 = vpop.f32.mrf.mxu0  ;;  %v292_v34 = vpop.f32.mrf.mxu1 }
  0xe3   :  { %362 = vst [vmem:[#allocation2 + $0xa8] sm:$0xff] %v176_v31  ;;  %364 = vst [vmem:[#allocation2 + $0xb8] sm:$0xff] %v289_v32  ;;  %v180_v35 = vadd.f32 %v179_v33, %v570_v45  ;;  %v293_v36 = vadd.f32 %v292_v34, %v572_v46 }
  0xe4   :  { %v181_v37 = vpop.f32.mrf.mxu0  ;;  %v294_v38 = vpop.f32.mrf.mxu1 }
  0xe5   :  { %365 = vst [vmem:[#allocation2 + $0xc0] sm:$0xff] %v180_v35  ;;  %367 = vst [vmem:[#allocation2 + $0xd0] sm:$0xff] %v293_v36  ;;  %v182_v39 = vadd.f32 %v181_v37, %v574_v47  ;;  %v295_v40 = vadd.f32 %v294_v38, %v576_v48 }
  0xe6   :  { %v183_v41 = vpop.f32.mrf.mxu0  ;;  %v296_v42 = vpop.f32.mrf.mxu1 }
  0xe7   :  { %366 = vst [vmem:[#allocation2 + $0xc8] sm:$0xff] %v182_v39  ;;  %368 = vst [vmem:[#allocation2 + $0xd8] sm:$0xff] %v295_v40  ;;  %v184_v43 = vadd.f32 %v183_v41, %v570_v45  ;;  %v297_v44 = vadd.f32 %v296_v42, %v572_v46 }
  0xe8   :  { %v185_v49 = vpop.f32.mrf.mxu0  ;;  %v298_v50 = vpop.f32.mrf.mxu1 }
  0xe9   :  { %369 = vst [vmem:[#allocation2 + $0xe0] sm:$0xff] %v184_v43  ;;  %371 = vst [vmem:[#allocation2 + $0xf0] sm:$0xff] %v297_v44  ;;  %v186_v51 = vadd.f32 %v185_v49, %v574_v47  ;;  %v299_v52 = vadd.f32 %v298_v50, %v576_v48 }
  0xea   :  { %v189_v53 = vpop.f32.mrf.mxu0  ;;  %v302_v54 = vpop.f32.mrf.mxu1 }
  0xeb   :  { %370 = vst [vmem:[#allocation2 + $0xe8] sm:$0xff] %v186_v51  ;;  %372 = vst [vmem:[#allocation2 + $0xf8] sm:$0xff] %v299_v52  ;;  %v190_v55 = vadd.f32 %v189_v53, %v570_v45  ;;  %v303_v56 = vadd.f32 %v302_v54, %v572_v46 }
  0xec   :  { %v191_v57 = vpop.f32.mrf.mxu0  ;;  %v304_v58 = vpop.f32.mrf.mxu1 }
  0xed   :  { %373 = vst [vmem:[#allocation2 + $0x100] sm:$0xff] %v190_v55  ;;  %375 = vst [vmem:[#allocation2 + $0x110] sm:$0xff] %v303_v56  ;;  %v192_v59 = vadd.f32 %v191_v57, %v574_v47  ;;  %v305_v60 = vadd.f32 %v304_v58, %v576_v48 }
  0xee   :  { %v193_v61 = vpop.f32.mrf.mxu0  ;;  %v306_v62 = vpop.f32.mrf.mxu1 }
  0xef   :  { %374 = vst [vmem:[#allocation2 + $0x108] sm:$0xff] %v192_v59  ;;  %376 = vst [vmem:[#allocation2 + $0x118] sm:$0xff] %v305_v60  ;;  %v194_v63 = vadd.f32 %v193_v61, %v570_v45  ;;  %v307_v0 = vadd.f32 %v306_v62, %v572_v46 }
  0xf0   :  { %v195_v1 = vpop.f32.mrf.mxu0  ;;  %v308_v2 = vpop.f32.mrf.mxu1 }
  0xf1   :  { %377 = vst [vmem:[#allocation2 + $0x120] sm:$0xff] %v194_v63  ;;  %379 = vst [vmem:[#allocation2 + $0x130] sm:$0xff] %v307_v0  ;;  %v196_v3 = vadd.f32 %v195_v1, %v574_v47  ;;  %v309_v4 = vadd.f32 %v308_v2, %v576_v48 }
  0xf2   :  { %v199_v5 = vpop.f32.mrf.mxu0  ;;  %v312_v6 = vpop.f32.mrf.mxu1 }
  0xf3   :  { %378 = vst [vmem:[#allocation2 + $0x128] sm:$0xff] %v196_v3  ;;  %380 = vst [vmem:[#allocation2 + $0x138] sm:$0xff] %v309_v4  ;;  %v200_v7 = vadd.f32 %v199_v5, %v570_v45  ;;  %v313_v8 = vadd.f32 %v312_v6, %v572_v46 }
  0xf4   :  { %v201_v9 = vpop.f32.mrf.mxu0  ;;  %v314_v10 = vpop.f32.mrf.mxu1 }
  0xf5   :  { %381 = vst [vmem:[#allocation2 + $0x140] sm:$0xff] %v200_v7  ;;  %383 = vst [vmem:[#allocation2 + $0x150] sm:$0xff] %v313_v8  ;;  %v202_v11 = vadd.f32 %v201_v9, %v574_v47  ;;  %v315_v12 = vadd.f32 %v314_v10, %v576_v48 }
  0xf6   :  { %v203_v13 = vpop.f32.mrf.mxu0  ;;  %v316_v14 = vpop.f32.mrf.mxu1 }
  0xf7   :  { %382 = vst [vmem:[#allocation2 + $0x148] sm:$0xff] %v202_v11  ;;  %384 = vst [vmem:[#allocation2 + $0x158] sm:$0xff] %v315_v12  ;;  %v204_v15 = vadd.f32 %v203_v13, %v570_v45  ;;  %v317_v16 = vadd.f32 %v316_v14, %v572_v46 }
  0xf8   :  { %v205_v17 = vpop.f32.mrf.mxu0  ;;  %v318_v18 = vpop.f32.mrf.mxu1 }
  0xf9   :  { %385 = vst [vmem:[#allocation2 + $0x160] sm:$0xff] %v204_v15  ;;  %387 = vst [vmem:[#allocation2 + $0x170] sm:$0xff] %v317_v16  ;;  %v206_v19 = vadd.f32 %v205_v17, %v574_v47  ;;  %v319_v20 = vadd.f32 %v318_v18, %v576_v48 }
  0xfa   :  { %v209_v21 = vpop.f32.mrf.mxu0  ;;  %v322_v22 = vpop.f32.mrf.mxu1 }
  0xfb   :  { %386 = vst [vmem:[#allocation2 + $0x168] sm:$0xff] %v206_v19  ;;  %388 = vst [vmem:[#allocation2 + $0x178] sm:$0xff] %v319_v20  ;;  %v210_v23 = vadd.f32 %v209_v21, %v570_v45  ;;  %v323_v24 = vadd.f32 %v322_v22, %v572_v46 }
  0xfc   :  { %v211_v25 = vpop.f32.mrf.mxu0  ;;  %v324_v26 = vpop.f32.mrf.mxu1 }
  0xfd   :  { %389 = vst [vmem:[#allocation2 + $0x180] sm:$0xff] %v210_v23  ;;  %391 = vst [vmem:[#allocation2 + $0x190] sm:$0xff] %v323_v24  ;;  %v212_v27 = vadd.f32 %v211_v25, %v574_v47  ;;  %v325_v28 = vadd.f32 %v324_v26, %v576_v48 }
  0xfe   :  { %v213_v29 = vpop.f32.mrf.mxu0  ;;  %v326_v30 = vpop.f32.mrf.mxu1 }
  0xff   :  { %390 = vst [vmem:[#allocation2 + $0x188] sm:$0xff] %v212_v27  ;;  %392 = vst [vmem:[#allocation2 + $0x198] sm:$0xff] %v325_v28  ;;  %v214_v31 = vadd.f32 %v213_v29, %v570_v45  ;;  %v327_v32 = vadd.f32 %v326_v30, %v572_v46 }
 0x100   :  { %v215_v33 = vpop.f32.mrf.mxu0  ;;  %v328_v34 = vpop.f32.mrf.mxu1 }
 0x101   :  { %393 = vst [vmem:[#allocation2 + $0x1a0] sm:$0xff] %v214_v31  ;;  %395 = vst [vmem:[#allocation2 + $0x1b0] sm:$0xff] %v327_v32  ;;  %v216_v35 = vadd.f32 %v215_v33, %v574_v47  ;;  %v329_v36 = vadd.f32 %v328_v34, %v576_v48 }
 0x102   :  { %v219_v37 = vpop.f32.mrf.mxu0  ;;  %v332_v38 = vpop.f32.mrf.mxu1 }
 0x103   :  { %394 = vst [vmem:[#allocation2 + $0x1a8] sm:$0xff] %v216_v35  ;;  %396 = vst [vmem:[#allocation2 + $0x1b8] sm:$0xff] %v329_v36  ;;  %v220_v39 = vadd.f32 %v219_v37, %v570_v45  ;;  %v333_v40 = vadd.f32 %v332_v38, %v572_v46 }
 0x104   :  { %v221_v41 = vpop.f32.mrf.mxu0  ;;  %v334_v42 = vpop.f32.mrf.mxu1 }
 0x105   :  { %397 = vst [vmem:[#allocation2 + $0x1c0] sm:$0xff] %v220_v39  ;;  %399 = vst [vmem:[#allocation2 + $0x1d0] sm:$0xff] %v333_v40  ;;  %v222_v43 = vadd.f32 %v221_v41, %v574_v47  ;;  %v335_v44 = vadd.f32 %v334_v42, %v576_v48 }
 0x106   :  { %v223_v49 = vpop.f32.mrf.mxu0  ;;  %v336_v50 = vpop.f32.mrf.mxu1 }
 0x107   :  { %398 = vst [vmem:[#allocation2 + $0x1c8] sm:$0xff] %v222_v43  ;;  %400 = vst [vmem:[#allocation2 + $0x1d8] sm:$0xff] %v335_v44  ;;  %v224_v51 = vadd.f32 %v223_v49, %v570_v45  ;;  %v337_v52 = vadd.f32 %v336_v50, %v572_v46 }
 0x108   :  { %v225_v53 = vpop.f32.mrf.mxu0  ;;  %v338_v54 = vpop.f32.mrf.mxu1 }
 0x109   :  { %401 = vst [vmem:[#allocation2 + $0x1e0] sm:$0xff] %v224_v51  ;;  %403 = vst [vmem:[#allocation2 + $0x1f0] sm:$0xff] %v337_v52  ;;  %v226_v55 = vadd.f32 %v225_v53, %v574_v47  ;;  %v339_v56 = vadd.f32 %v338_v54, %v576_v48 }
 0x10b   :  { %402 = vst [vmem:[#allocation2 + $0x1e8] sm:$0xff] %v226_v55  ;;  %404 = vst [vmem:[#allocation2 + $0x1f8] sm:$0xff] %v339_v56 }
 0x10c   :  { %461 = shalt.err (!%p458_p4)
}
 0x10d   :  { %s475_s22 = smov 512   ;;  %s476_s23 = smov 32  }
 0x10e   :  { %416 = dma.vmem_to_hbm [thread:$0]  %s411_s2, 8192, %s648_s3, [#allocation3], %s475_s22, %s475_s22, %s476_s23  }
 0x10f   :  { %470 = dma.done.wait [#allocation3], 8192  }
 0x110   :  { %471 = vsyncadd [#allocation3], 4294959104 }
 0x111   :  { %420 = vsyncpa [#allocation3], 1 }

</bundles_post_ra>
